<compile_context>
chip_gen: v6e
topology: v6e:2x2x1
jax: 0.10.0
libtpu: 0.0.40
codegen_flags: <defaults>
</compile_context>

<pallas_src>
import jax
import jax.numpy as jnp
from jax.experimental import pallas as pl
from jax.experimental.pallas import tpu as pltpu


def _round_up(x, m):
    return ((x + m - 1) // m) * m


# --------------------------------------------------------------------------- #
# Kernel
# --------------------------------------------------------------------------- #
def _transcoder_kernel(x_ref, b_dec_ref, w_enc_ref, b_enc_ref, w_dec_ref,
                       b_out_ref, o_ref, *scratch):
    """One (row-tile, hidden-chunk) grid step.

    x_ref:     (tm, d_in)    input dtype   token rows (cast to bf16 in-kernel)
    b_dec_ref: (1, d_in)     f32           decoder bias (subtracted from input)
    w_enc_ref: (d_in, th)    bf16          encoder weight chunk
    b_enc_ref: (1, th)       f32           encoder bias chunk
    w_dec_ref: (th, d_out)   bf16          decoder weight chunk
    b_out_ref: (1, d_out)    f32           output bias
    o_ref:     (tm, d_out)   out dtype     output tile (resident across hidden axis)
    scratch:   optional (tm, d_out) f32 accumulator; when the output dtype is f32
               we accumulate directly into o_ref instead.
    """
    acc_ref = scratch[0] if scratch else o_ref
    h = pl.program_id(1)

    @pl.when(h == 0)
    def _():
        acc_ref[...] = jnp.zeros_like(acc_ref)

    # (x - b_dec) in f32 on the VPU, then cast to bf16 for the MXU.
    x_centered = x_ref[...].astype(jnp.float32) - b_dec_ref[...]
    x_bf = x_centered.astype(jnp.bfloat16)

    # Encoder matmul for this hidden chunk: bf16 operands, f32 accumulation.
    hidden_pre = jnp.dot(x_bf, w_enc_ref[...],
                         preferred_element_type=jnp.float32)
    feats = jnp.maximum(hidden_pre + b_enc_ref[...], 0.0)      # bias + ReLU in f32
    feats = feats.astype(w_dec_ref.dtype)                      # bf16 for 2nd MXU pass

    # Decoder partial product, accumulated in f32.
    acc_ref[...] += jnp.dot(feats, w_dec_ref[...],
                            preferred_element_type=jnp.float32)

    @pl.when(h == pl.num_programs(1) - 1)
    def _():
        o_ref[...] = (acc_ref[...] + b_out_ref[...]).astype(o_ref.dtype)


# --------------------------------------------------------------------------- #
# One-time parameter preparation (hoisted out of the per-call hot path)
# --------------------------------------------------------------------------- #
def prepare_transcoder_params(params, *, th=1024):
    """Cast weights to bf16 and pad the hidden dim once; reuse across forwards."""
    w_enc = jnp.asarray(params["W_enc"])                    # (d_in, d_hidden)
    b_enc = jnp.asarray(params["b_enc"]).reshape(1, -1)     # (1, d_hidden)
    w_dec = jnp.asarray(params["W_dec"])                    # (d_hidden, d_out)
    b_dec = jnp.asarray(params["b_dec"]).reshape(1, -1)     # (1, d_in)
    b_dec_out = jnp.asarray(params["b_dec_out"]).reshape(1, -1)  # (1, d_out)

    d_in, d_hidden = w_enc.shape
    d_out = w_dec.shape[1]

    th_eff = min(_round_up(max(th, 128), 128), _round_up(d_hidden, 128))
    h_pad = _round_up(d_hidden, th_eff)

    w_enc_bf = w_enc.astype(jnp.bfloat16)
    w_dec_bf = w_dec.astype(jnp.bfloat16)
    b_enc_f = b_enc.astype(jnp.float32)
    if h_pad != d_hidden:
        dh = h_pad - d_hidden
        w_enc_bf = jnp.pad(w_enc_bf, ((0, 0), (0, dh)))
        b_enc_f = jnp.pad(b_enc_f, ((0, 0), (0, dh)))
        w_dec_bf = jnp.pad(w_dec_bf, ((0, dh), (0, 0)))   # zero rows contribute 0

    return {
        "W_enc_bf16": w_enc_bf,
        "b_enc_f32": b_enc_f,
        "W_dec_bf16": w_dec_bf,
        "b_dec_f32": b_dec.astype(jnp.float32),
        "b_dec_out_f32": b_dec_out.astype(jnp.float32),
        "d_in": d_in, "d_hidden": d_hidden, "d_out": d_out,
        "th": th_eff, "h_pad": h_pad,
    }


def _vmem_bytes(tm, th, d_in, d_out, x_bytes, out_bytes, use_scratch):
    """Conservative estimate of the kernel's VMEM footprint (double-buffered)."""
    b = 0
    b += 2 * tm * d_in * x_bytes        # x tiles
    b += 2 * d_in * th * 2              # W_enc chunks (bf16)
    b += 2 * th * d_out * 2             # W_dec chunks (bf16)
    b += 2 * tm * d_out * out_bytes     # output tiles
    b += 2 * 8 * th * 4                 # b_enc (padded to 8 sublanes)
    b += 2 * 8 * d_in * 4               # b_dec
    b += 2 * 8 * d_out * 4              # b_dec_out
    if use_scratch:
        b += tm * d_out * 4             # f32 accumulator
    return b


# --------------------------------------------------------------------------- #
# Forward
# --------------------------------------------------------------------------- #
def transcoder_wrapper_forward(x, prepared, *, tm=None,
                               vmem_budget_bytes=44 << 20):
    """x: (B, S, d_in). prepared: output of prepare_transcoder_params.
    Returns sae_out: (B, S, d_out)."""
    d_in = prepared["d_in"]
    d_out = prepared["d_out"]
    th_eff = prepared["th"]
    h_pad = prepared["h_pad"]

    B, S, _ = x.shape
    M = B * S
    x_bytes = x.dtype.itemsize
    out_dtype = x.dtype
    out_bytes = jnp.dtype(out_dtype).itemsize
    use_scratch = out_dtype != jnp.float32   # accumulate directly into o_ref if f32

    # ---- row tile selection (multiple of 8, sized against the VMEM budget) ----
    m_cap = _round_up(M, 8)
    if tm is not None:
        tm_eff = min(_round_up(max(tm, 8), 8), m_cap)
    else:
        tm_eff = min(8, m_cap)
        for cand in (1024, 768, 512, 384, 256, 128, 64, 32, 16, 8):
            c = min(cand, m_cap)
            if _vmem_bytes(c, th_eff, d_in, d_out, x_bytes, out_bytes,
                           use_scratch) <= vmem_budget_bytes:
                tm_eff = c
                break
    m_pad = _round_up(M, tm_eff)

    x2d = x.reshape(M, d_in)
    if m_pad != M:
        x2d = jnp.pad(x2d, ((0, m_pad - M), (0, 0)))

    grid = (m_pad // tm_eff, h_pad // th_eff)
    n_row_tiles = grid[0]

    # ---- scheduler hints: count weight re-streaming per row tile ----
    flops = 2 * m_pad * (d_in * h_pad + h_pad * d_out)
    bytes_accessed = (
        m_pad * d_in * x_bytes
        + n_row_tiles * (d_in * h_pad * 2 + h_pad * d_out * 2 + h_pad * 4)
        + m_pad * d_out * out_bytes
        + d_in * 4 + d_out * 4)

    # ---- explicit scoped-VMEM allowance from the buffer math ----
    vmem_est = _vmem_bytes(tm_eff, th_eff, d_in, d_out, x_bytes, out_bytes,
                           use_scratch)
    vmem_limit = min(max(vmem_est + (16 << 20), 32 << 20), 128 << 20)

    scratch_shapes = ([pltpu.VMEM((tm_eff, d_out), jnp.float32)]
                      if use_scratch else [])

    out2d = pl.pallas_call(
        _transcoder_kernel,
        out_shape=jax.ShapeDtypeStruct((m_pad, d_out), out_dtype),
        grid_spec=pltpu.PrefetchScalarGridSpec(
            num_scalar_prefetch=0,
            grid=grid,
            in_specs=[
                pl.BlockSpec((tm_eff, d_in), lambda i, h: (i, 0)),     # x rows
                pl.BlockSpec((1, d_in), lambda i, h: (0, 0)),          # b_dec
                pl.BlockSpec((d_in, th_eff), lambda i, h: (0, h)),     # W_enc chunk
                pl.BlockSpec((1, th_eff), lambda i, h: (0, h)),        # b_enc chunk
                pl.BlockSpec((th_eff, d_out), lambda i, h: (h, 0)),    # W_dec chunk
                pl.BlockSpec((1, d_out), lambda i, h: (0, 0)),         # b_dec_out
            ],
            out_specs=pl.BlockSpec((tm_eff, d_out), lambda i, h: (i, 0)),
            scratch_shapes=scratch_shapes,
        ),
        compiler_params=pltpu.CompilerParams(
            dimension_semantics=("parallel", "arbitrary"),
            vmem_limit_bytes=vmem_limit),
        cost_estimate=pl.CostEstimate(flops=flops, transcendentals=0,
                                      bytes_accessed=bytes_accessed),
    )(x2d,
      prepared["b_dec_f32"],
      prepared["W_enc_bf16"],
      prepared["b_enc_f32"],
      prepared["W_dec_bf16"],
      prepared["b_dec_out_f32"])

    return out2d[:M].reshape(B, S, d_out)


# --------------------------------------------------------------------------- #
# Pure-JAX reference (matches the original PyTorch transcoder forward)
# --------------------------------------------------------------------------- #
def _reference(x, params):
    sae_in = x - params["b_dec"][0]
    hidden = jnp.maximum(sae_in @ params["W_enc"] + params["b_enc"][0], 0.0)
    return hidden @ params["W_dec"] + params["b_dec_out"][0]


if __name__ == "__main__":
    key = jax.random.PRNGKey(0)
    kx, k1, k2, k3, k4, k5 = jax.random.split(key, 6)

    # Small but lane-friendly shapes (multiples of 128 on feature dims).
    B, S = 2, 8
    d_in, d_hidden, d_out = 128, 256, 128

    x = jax.random.normal(kx, (B, S, d_in), dtype=jnp.float32)
    params = {
        "W_enc": jax.random.normal(k1, (d_in, d_hidden), jnp.float32) * 0.1,
        "b_enc": jax.random.normal(k2, (1, d_hidden), jnp.float32) * 0.01,
        "W_dec": jax.random.normal(k3, (d_hidden, d_out), jnp.float32) * 0.1,
        "b_dec": jax.random.normal(k4, (1, d_in), jnp.float32) * 0.01,
        "b_dec_out": jax.random.normal(k5, (1, d_out), jnp.float32) * 0.01,
    }

    # One-time weight preparation (cast + pad), then the hot-path forward.
    prepared = prepare_transcoder_params(params)
    out = transcoder_wrapper_forward(x, prepared)
    out = jax.block_until_ready(out)

    ref = _reference(x, params)
    assert out.shape == (B, S, d_out)
    # bf16 MXU operands with f32 accumulation vs. pure-f32 reference -> relaxed tolerance.
    assert jnp.allclose(out, ref, atol=5e-2, rtol=5e-2), "mismatch vs reference"

    print("KERNEL_OK")
</pallas_src>

<mosaic_0001>
module attributes {stable_mosaic.version = 11 : i64} {
  func.func @_transcoder_kernel(%arg0: i32, %arg1: i32, %arg2: memref<16x128xf32, #tpu.memory_space<vmem>>, %arg3: memref<1x128xf32, #tpu.memory_space<vmem>>, %arg4: memref<128x256xbf16, #tpu.memory_space<vmem>>, %arg5: memref<1x256xf32, #tpu.memory_space<vmem>>, %arg6: memref<256x128xbf16, #tpu.memory_space<vmem>>, %arg7: memref<1x128xf32, #tpu.memory_space<vmem>>, %arg8: memref<16x128xf32, #tpu.memory_space<vmem>>) attributes {dimension_semantics = [#tpu.dimension_semantics<parallel>, #tpu.dimension_semantics<arbitrary>], iteration_bounds = array<i64: 1, 1>, scalar_prefetch = 0 : i64, scratch_operands = 0 : i64, tpu.core_type = #tpu.core_type<tc>, window_params = [{transform_indices = @transform_0, window_bounds = array<i64: 16, 128>}, {pipeline_mode = #tpu.pipeline_mode<synchronous>, transform_indices = @transform_1, window_bounds = array<i64: 1, 128>}, {transform_indices = @transform_2, window_bounds = array<i64: 128, 256>}, {transform_indices = @transform_3, window_bounds = array<i64: 1, 256>}, {transform_indices = @transform_4, window_bounds = array<i64: 256, 128>}, {pipeline_mode = #tpu.pipeline_mode<synchronous>, transform_indices = @transform_5, window_bounds = array<i64: 1, 128>}, {transform_indices = @transform_6, window_bounds = array<i64: 16, 128>}]} {
    %c0_i32 = arith.constant 0 : i32
    %0 = arith.cmpi eq, %arg1, %c0_i32 : i32
    %1 = arith.extui %0 : i1 to i32
    %c0_i32_0 = arith.constant 0 : i32
    %2 = arith.cmpi ne, %1, %c0_i32_0 : i32
    scf.if %2 {
      %cst_18 = arith.constant 0.000000e+00 : f32
      %24 = vector.broadcast %cst_18 : f32 to vector<16x128xf32>
      %c0_19 = arith.constant 0 : index
      %c0_20 = arith.constant 0 : index
      %25 = vector.load %arg8[%c0_19, %c0_20] : memref<16x128xf32, #tpu.memory_space<vmem>>, vector<16x128xf32>
      tpu.vector_store %arg8[%c0_19, %c0_20], %24 {strides = array<i32>} : memref<16x128xf32, #tpu.memory_space<vmem>>, vector<16x128xf32>,
    } else {
    }
    %c0 = arith.constant 0 : index
    %c0_1 = arith.constant 0 : index
    %3 = vector.load %arg2[%c0, %c0_1] : memref<16x128xf32, #tpu.memory_space<vmem>>, vector<16x128xf32>
    %c0_2 = arith.constant 0 : index
    %c0_3 = arith.constant 0 : index
    %4 = vector.load %arg3[%c0_2, %c0_3] : memref<1x128xf32, #tpu.memory_space<vmem>>, vector<1x128xf32>
    %5 = vector.broadcast %4 : vector<1x128xf32> to vector<16x128xf32>
    %6 = arith.subf %3, %5 : vector<16x128xf32>
    %7 = arith.truncf %6 : vector<16x128xf32> to vector<16x128xbf16>
    %c0_4 = arith.constant 0 : index
    %c0_5 = arith.constant 0 : index
    %8 = vector.load %arg4[%c0_4, %c0_5] : memref<128x256xbf16, #tpu.memory_space<vmem>>, vector<128x256xbf16>
    %cst = arith.constant dense<0.000000e+00> : vector<16x256xf32>
    %9 = tpu.matmul %7, %8, %cst {dimension_numbers = #tpu.dot_dimension_numbers<[1], [0], [0], [1], [0, 0, 1, 1], [], []>} : vector<16x128xbf16>, vector<128x256xbf16>, vector<16x256xf32> -> vector<16x256xf32>
    %c0_6 = arith.constant 0 : index
    %c0_7 = arith.constant 0 : index
    %10 = vector.load %arg5[%c0_6, %c0_7] : memref<1x256xf32, #tpu.memory_space<vmem>>, vector<1x256xf32>
    %11 = vector.broadcast %10 : vector<1x256xf32> to vector<16x256xf32>
    %12 = arith.addf %9, %11 : vector<16x256xf32>
    %cst_8 = arith.constant 0.000000e+00 : f32
    %13 = vector.broadcast %cst_8 : f32 to vector<16x256xf32>
    %14 = arith.maximumf %12, %13 : vector<16x256xf32>
    %15 = arith.truncf %14 : vector<16x256xf32> to vector<16x256xbf16>
    %c0_9 = arith.constant 0 : index
    %c0_10 = arith.constant 0 : index
    %16 = vector.load %arg8[%c0_9, %c0_10] : memref<16x128xf32, #tpu.memory_space<vmem>>, vector<16x128xf32>
    %c0_11 = arith.constant 0 : index
    %c0_12 = arith.constant 0 : index
    %17 = vector.load %arg6[%c0_11, %c0_12] : memref<256x128xbf16, #tpu.memory_space<vmem>>, vector<256x128xbf16>
    %cst_13 = arith.constant dense<0.000000e+00> : vector<16x128xf32>
    %18 = tpu.matmul %15, %17, %cst_13 {dimension_numbers = #tpu.dot_dimension_numbers<[1], [0], [0], [1], [0, 0, 1, 1], [], []>} : vector<16x256xbf16>, vector<256x128xbf16>, vector<16x128xf32> -> vector<16x128xf32>
    %19 = arith.addf %16, %18 : vector<16x128xf32>
    %c0_14 = arith.constant 0 : index
    %c0_15 = arith.constant 0 : index
    %20 = vector.load %arg8[%c0_14, %c0_15] : memref<16x128xf32, #tpu.memory_space<vmem>>, vector<16x128xf32>
    tpu.vector_store %arg8[%c0_14, %c0_15], %19 {strides = array<i32>} : memref<16x128xf32, #tpu.memory_space<vmem>>, vector<16x128xf32>,
    %c0_i32_16 = arith.constant 0 : i32
    %21 = arith.cmpi eq, %arg1, %c0_i32_16 : i32
    %22 = arith.extui %21 : i1 to i32
    %c0_i32_17 = arith.constant 0 : i32
    %23 = arith.cmpi ne, %22, %c0_i32_17 : i32
    scf.if %23 {
      %c0_18 = arith.constant 0 : index
      %c0_19 = arith.constant 0 : index
      %24 = vector.load %arg8[%c0_18, %c0_19] : memref<16x128xf32, #tpu.memory_space<vmem>>, vector<16x128xf32>
      %c0_20 = arith.constant 0 : index
      %c0_21 = arith.constant 0 : index
      %25 = vector.load %arg7[%c0_20, %c0_21] : memref<1x128xf32, #tpu.memory_space<vmem>>, vector<1x128xf32>
      %26 = vector.broadcast %25 : vector<1x128xf32> to vector<16x128xf32>
      %27 = arith.addf %24, %26 : vector<16x128xf32>
      %c0_22 = arith.constant 0 : index
      %c0_23 = arith.constant 0 : index
      %28 = vector.load %arg8[%c0_22, %c0_23] : memref<16x128xf32, #tpu.memory_space<vmem>>, vector<16x128xf32>
      tpu.vector_store %arg8[%c0_22, %c0_23], %27 {strides = array<i32>} : memref<16x128xf32, #tpu.memory_space<vmem>>, vector<16x128xf32>,
    } else {
    }
    return
  }
  func.func @transform_0(%arg0: i32, %arg1: i32) -> (i32, i32) {
    %c0_i32 = arith.constant 0 : i32
    %c0_i32_0 = arith.constant 0 : i32
    return %arg0, %c0_i32 : i32, i32
  }
  func.func @transform_1(%arg0: i32, %arg1: i32) -> (i32, i32) {
    %c0_i32 = arith.constant 0 : i32
    %c0_i32_0 = arith.constant 0 : i32
    %c0_i32_1 = arith.constant 0 : i32
    return %c0_i32, %c0_i32_0 : i32, i32
  }
  func.func @transform_2(%arg0: i32, %arg1: i32) -> (i32, i32) {
    %c0_i32 = arith.constant 0 : i32
    %c0_i32_0 = arith.constant 0 : i32
    return %c0_i32, %arg1 : i32, i32
  }
  func.func @transform_3(%arg0: i32, %arg1: i32) -> (i32, i32) {
    %c0_i32 = arith.constant 0 : i32
    %c0_i32_0 = arith.constant 0 : i32
    return %c0_i32, %arg1 : i32, i32
  }
  func.func @transform_4(%arg0: i32, %arg1: i32) -> (i32, i32) {
    %c0_i32 = arith.constant 0 : i32
    %c0_i32_0 = arith.constant 0 : i32
    return %arg1, %c0_i32 : i32, i32
  }
  func.func @transform_5(%arg0: i32, %arg1: i32) -> (i32, i32) {
    %c0_i32 = arith.constant 0 : i32
    %c0_i32_0 = arith.constant 0 : i32
    %c0_i32_1 = arith.constant 0 : i32
    return %c0_i32, %c0_i32_0 : i32, i32
  }
  func.func @transform_6(%arg0: i32, %arg1: i32) -> (i32, i32) {
    %c0_i32 = arith.constant 0 : i32
    %c0_i32_0 = arith.constant 0 : i32
    return %arg0, %c0_i32 : i32, i32
  }
}

</mosaic_0001>

<bundles_post_ra>
// kernel: tpu_custom_call.1
= control target key start
LH: loop header
LB: loop body
LE: loop exit
PB: predicated region body
PF: predicated region fallthrough
CT: control target
= control target key end

     0   :  { %11 = vsyncpa [#allocation3], 0  ;;  %s716_s0 = inlined_call_operand.hbm [shape: f32[16,128], index: 0, kind: input, shape index: {}]   ;;  %s717_s1 = inlined_call_operand.vmem [shape: f32[1,128], index: 1, kind: input, shape index: {}]   ;;  %s718_s2 = inlined_call_operand.hbm [shape: bf16[128,256], index: 2, kind: input, shape index: {}]   ;;  %s719_s3 = inlined_call_operand.vmem [shape: f32[1,256], index: 3, kind: input, shape index: {}]   ;;  %s720_s4 = inlined_call_operand.hbm [shape: bf16[256,128], index: 4, kind: input, shape index: {}]   ;;  %s721_s5 = inlined_call_operand.vmem [shape: f32[1,128], index: 5, kind: input, shape index: {}]   ;;  %s722_s6 = inlined_call_operand.hbm [shape: f32[16,128], index: 6, kind: output, shape index: {}]  }
   0x1   :  { %12 = vsyncpa [#allocation6], 0 }
   0x2   :  { %13 = vsyncpa [#allocation4], 0  ;;  %s642_s21 = smov [#allocation5]   ;;  %s643_s23 = smov [#allocation2]  }
   0x3   :  { %s33_s22 = sshll.u32 %s642_s21, 4  ;;  %s19_s24 = sshll.u32 %s643_s23, 4  ;;  %s34_s22 = int_to_ptr.vmem [resolvable:$true] %s33_s22  ;;  %s20_s24 = int_to_ptr.vmem [resolvable:$true] %s19_s24 }
   0x4   :  { %s564_s25 = scalar_lea.vmem %s34_s22, 2048  ;;  %p569_p1 = scmp.lt.s32.totalorder %s34_s22, %s34_s22 }
   0x5   :  { %p565_p0 = scmp.ne.s32.totalorder %s34_s22, %s564_s25  ;;  %p570_p2 = scmp.lt.s32.totalorder %s564_s25, %s564_s25 }
   0x7   :  { %p571_p3 = por %p570_p2, %p569_p1 }
   0x9   :  { %p572_p4 = pnand %p571_p3, %p565_p0 }
   0xb   :  { %575 = shalt.err (!%p572_p4)
}
   0xc   :  { %s644_s26 = smov 128   ;;  %s645_s27 = smov 8  }
   0xd   :  { %39 = dma.hbm_to_vmem [thread:$0]  %s718_s2, 2048, %s34_s22, [#allocation6], %s644_s26, %s644_s26, %s645_s27  }
   0xe   :  { %s584_s30 = scalar_lea.vmem %s20_s24, 256  ;;  %p589_p6 = scmp.lt.s32.totalorder %s20_s24, %s20_s24 }
   0xf   :  { %p585_p5 = scmp.ne.s32.totalorder %s20_s24, %s584_s30  ;;  %p590_p7 = scmp.lt.s32.totalorder %s584_s30, %s584_s30 }
  0x11   :  { %p591_p8 = por %p590_p7, %p589_p6 }
  0x13   :  { %p592_p9 = pnand %p591_p8, %p585_p5 }
  0x15   :  { %595 = shalt.err (!%p592_p9)
}
  0x16   :  { %25 = dma.hbm_to_vmem [thread:$0]  %s716_s0, 256, %s20_s24, [#allocation3], %s644_s26, %s644_s26, %s645_s27  }
  0x17   :  { %s646_s9 = smov [#allocation7]  }
  0x18   :  { %s47_s10 = sshll.u32 %s646_s9, 4  ;;  %s48_s10 = int_to_ptr.vmem [resolvable:$true] %s47_s10 }
  0x19   :  { %s604_s11 = scalar_lea.vmem %s48_s10, 2048  ;;  %p609_p11 = scmp.lt.s32.totalorder %s48_s10, %s48_s10 }
  0x1a   :  { %p605_p10 = scmp.ne.s32.totalorder %s48_s10, %s604_s11  ;;  %p610_p12 = scmp.lt.s32.totalorder %s604_s11, %s604_s11 }
  0x1c   :  { %p611_p13 = por %p610_p12, %p609_p11 }
  0x1e   :  { %p612_p0 = pnand %p611_p13, %p605_p10 }
  0x20   :  { %615 = shalt.err (!%p612_p0)
}
  0x21   :  { %s647_s2 = smov 64   ;;  %s648_s12 = smov 4  }
  0x22   :  { %53 = dma.hbm_to_vmem [thread:$0]  %s720_s4, 2048, %s48_s10, [#allocation6], %s647_s2, %s647_s2, %s648_s12  }
  0x23   :  { %636 = dma.done.wait [#allocation3], 256  }
  0x24   :  { %637 = vsyncadd [#allocation3], 4294967040 }
  0x25   :  { %638 = dma.done.wait [#allocation6], 4096  }
  0x26   :  { %639 = vsyncadd [#allocation6], 4294963200  ;;  %v649_v0 = vmov 0   ;;  %v516_v1 = vld [vmem:[#allocation5 + $0x74] ss:$8 sps:$4 sm:$0xff]   ;;  %v544_v16 = vld [vmem:[#allocation7 + $0x68] sm:$0xff]   ;;  %v102_v39 = vlaneseq }
  0x27   :  { %224 = vmatprep.mubr.bf16.mxu0 %v649_v0  ;;  %v518_v2 = vld [vmem:[#allocation5 + $0x70] ss:$8 sps:$4 sm:$0xff]   ;;  %192 = vmatprep.subr.bf16.mxu0 %v516_v1  ;;  %v519_v3 = vld [vmem:[#allocation5 + $0x64] ss:$8 sps:$4 sm:$0xff]   ;;  %v521_v4 = vld [vmem:[#allocation5 + $0x60] ss:$8 sps:$4 sm:$0xff]  }
  0x28   :  { %193 = vmatpush1.bf16.msra.mxu0 %v518_v2  ;;  %v522_v5 = vld [vmem:[#allocation5 + $0x54] ss:$8 sps:$4 sm:$0xff]   ;;  %v524_v6 = vld [vmem:[#allocation5 + $0x50] ss:$8 sps:$4 sm:$0xff]   ;;  %v525_v7 = vld [vmem:[#allocation5 + $0x44] ss:$8 sps:$4 sm:$0xff]  }
  0x29   :  { %194 = vmatprep.subr.bf16.mxu0 %v519_v3  ;;  %v527_v8 = vld [vmem:[#allocation5 + $0x40] ss:$8 sps:$4 sm:$0xff]   ;;  %v528_v9 = vld [vmem:[#allocation5 + $0x34] ss:$8 sps:$4 sm:$0xff]   ;;  %v530_v11 = vld [vmem:[#allocation5 + $0x30] ss:$8 sps:$4 sm:$0xff]  }
  0x2a   :  { %v540_v10 = vld [vmem:[#allocation7 + $0x78] sm:$0xff]   ;;  %v531_v13 = vld [vmem:[#allocation5 + $0x24] ss:$8 sps:$4 sm:$0xff]   ;;  %v542_v14 = vld [vmem:[#allocation7 + $0x70] sm:$0xff]   ;;  %v103_v40 = vshrl.u32 %v102_v39, 7  ;;  %s650_s17 = smov [#allocation8]  }
  0x2b   :  { %v541_v12 = vld [vmem:[#allocation7 + $0x38] sm:$0xff]   ;;  %484 = vmatprep.subr.bf16.mxu1 %v540_v10  ;;  %v543_v15 = vld [vmem:[#allocation7 + $0x30] sm:$0xff]   ;;  %v533_v17 = vld [vmem:[#allocation5 + $0x20] ss:$8 sps:$4 sm:$0xff]   ;;  %s437_s18 = sshll.u32 %s650_s17, 4  ;;  %s438_s18 = int_to_ptr.vmem [resolvable:$true] %s437_s18 }
  0x2c   :  { %195 = vmatpush1.bf16.msra.mxu0 %v521_v4  ;;  %485 = vmatpush3.bf16.msra.mxu1 %v541_v12  ;;  %v534_v18 = vld [vmem:[#allocation5 + $0x14] ss:$8 sps:$4 sm:$0xff]   ;;  %v545_v19 = vld [vmem:[#allocation7 + $0x28] sm:$0xff]   ;;  %v546_v20 = vld [vmem:[#allocation7 + $0x60] sm:$0xff]   ;;  %v108_v41 = vsub.s32 1, %v103_v40  ;;  %v104_v42 = vsub.s32 0, %v103_v40  ;;  %p621_p2 = scmp.lt.s32.totalorder %s438_s18, %s438_s18 }
  0x2d   :  { %196 = vmatprep.subr.bf16.mxu0 %v522_v5  ;;  %486 = vmatprep.subr.bf16.mxu1 %v542_v14  ;;  %v536_v21 = vld [vmem:[#allocation5 + $0x10] ss:$8 sps:$4 sm:$0xff]   ;;  %v547_v25 = vld [vmem:[#allocation7 + $0x20] sm:$0xff]   ;;  %v552_v35 = vld [vmem:[#allocation7 + $0x48] sm:$0xff]   ;;  %s616_s19 = scalar_lea.vmem %s438_s18, 256 }
  0x2e   :  { %v72_v22 = vld [vmem:[#allocation2] sm:$0xff]  ;;  %v73_v23 = vld [vmem:[#allocation2 + $0x8] sm:$0xff]  ;;  %v537_v26 = vld [vmem:[#allocation5 + $0x4] ss:$8 sps:$4 sm:$0xff]   ;;  %p617_p1 = scmp.ne.s32.totalorder %s438_s18, %s616_s19  ;;  %p622_p3 = scmp.lt.s32.totalorder %s616_s19, %s616_s19 }
  0x2f   :  { %v450_v24 = vld [vmem:[%s717_s1] ss:$0 sm:$0xff]  ;;  %v548_v27 = vld [vmem:[#allocation7 + $0x58] sm:$0xff]   ;;  %v539_v30 = vld [vmem:[#allocation5] ss:$8 sps:$4 sm:$0xff]  }
  0x30   :  { %197 = vmatpush1.bf16.msra.mxu0 %v524_v6  ;;  %487 = vmatpush3.bf16.msra.mxu1 %v543_v15  ;;  %v81_v28 = vsub.f32 %v72_v22, %v450_v24  ;;  %v82_v29 = vsub.f32 %v73_v23, %v450_v24  ;;  %v549_v31 = vld [vmem:[#allocation7 + $0x18] sm:$0xff]   ;;  %v550_v33 = vld [vmem:[#allocation7 + $0x50] sm:$0xff]   ;;  %v553_v36 = vld [vmem:[#allocation7 + $0x8] sm:$0xff]   ;;  %p623_p4 = por %p622_p3, %p621_p2 }
  0x31   :  { %198 = vmatprep.subr.bf16.mxu0 %v525_v7  ;;  %488 = vmatprep.subr.bf16.mxu1 %v544_v16  ;;  %v551_v34 = vld [vmem:[#allocation7 + $0x10] sm:$0xff]   ;;  %v554_v37 = vld [vmem:[#allocation7 + $0x40] sm:$0xff]  }
  0x32   :  { %v83_v32 = vpack.c.bf16 %v82_v29, %v81_v28  ;;  %v555_v38 = vld [vmem:[#allocation7] sm:$0xff]   ;;  %v100_v43 = vld [vmem:[%s719_s3] sm:$0x3]  ;;  %p624_p5 = pnand %p623_p4, %p617_p1 }
  0x33   :  { %v109_v45 = vrot.slane %v100_v43, %v108_v41  ;;  %v105_v46 = vrot.slane %v100_v43, %v104_v42  ;;  %v483_v0 = vld [vmem:[%s721_s5] ss:$0 sm:$0xff] }
  0x34   :  { %199 = vmatpush1.bf16.msra.mxu0 %v527_v8  ;;  %489 = vmatpush3.bf16.msra.mxu1 %v545_v19 }
  0x35   :  { %200 = vmatprep.subr.bf16.mxu0 %v528_v9  ;;  %490 = vmatprep.subr.bf16.mxu1 %v546_v20 }
  0x38   :  { %201 = vmatpush1.bf16.msra.mxu0 %v530_v11  ;;  %491 = vmatpush3.bf16.msra.mxu1 %v547_v25 }
  0x39   :  { %202 = vmatprep.subr.bf16.mxu0 %v531_v13  ;;  %492 = vmatprep.subr.bf16.mxu1 %v548_v27 }
  0x3c   :  { %203 = vmatpush1.bf16.msra.mxu0 %v533_v17  ;;  %493 = vmatpush3.bf16.msra.mxu1 %v549_v31 }
  0x3d   :  { %204 = vmatprep.subr.bf16.mxu0 %v534_v18  ;;  %494 = vmatprep.subr.bf16.mxu1 %v550_v33 }
  0x40   :  { %205 = vmatpush1.bf16.msra.mxu0 %v536_v21  ;;  %495 = vmatpush3.bf16.msra.mxu1 %v551_v34 }
  0x41   :  { %206 = vmatprep.subr.bf16.mxu0 %v537_v26  ;;  %496 = vmatprep.subr.bf16.mxu1 %v552_v35 }
  0x44   :  { %207 = vmatpush1.bf16.msra.mxu0 %v539_v30  ;;  %497 = vmatpush3.bf16.msra.mxu1 %v553_v36 }
  0x45   :  { %498 = vmatprep.subr.bf16.mxu1 %v554_v37 }
  0x47   :  { %225 = vmatmul.mubr.bf16.vlgmr.msra.gmra.mxu0 %v83_v32 }
  0x48   :  { %499 = vmatpush3.bf16.msra.mxu1 %v555_v38 }
 0x107   :  { %v226_v44 = vpop.f32.mrf.mxu0 }
 0x108   :  { %v227_v51 = vadd.f32 %v226_v44, %v105_v46 }
 0x109   :  { %v228_v47 = vpop.f32.mrf.mxu0 }
 0x10a   :  { %v229_v49 = vadd.f32 %v228_v47, %v109_v45  ;;  %v235_v57 = vmax.f32 %v227_v51, 0.0 }
 0x10b   :  { %v230_v48 = vpop.f32.mrf.mxu0 }
 0x10c   :  { %v231_v50 = vadd.f32 %v230_v48, %v105_v46  ;;  %v236_v55 = vmax.f32 %v229_v49, 0.0 }
 0x10d   :  { %v232_v52 = vpop.f32.mrf.mxu0 }
 0x10e   :  { %v233_v53 = vadd.f32 %v232_v52, %v109_v45  ;;  %v237_v54 = vmax.f32 %v231_v50, 0.0 }
 0x110   :  { %v238_v56 = vmax.f32 %v233_v53, 0.0  ;;  %v239_v59 = vpack.c.bf16 %v237_v54, %v235_v57 }
 0x112   :  { %v240_v58 = vpack.c.bf16 %v238_v56, %v236_v55 }
 0x114   :  { %403 = vmatprep.mubr.bf16.mxu1 %v240_v58 }
 0x115   :  { %404 = vmatmul.mubr.bf16.vlgmr.msra.gmra.mxu1 %v239_v59 }
 0x1d5   :  { %v500_v60 = vpop.f32.mrf.mxu1 }
 0x1d7   :  { %v501_v61 = vpop.f32.mrf.mxu1 }
 0x1d8   :  { %v502_v62 = vadd.f32 %v501_v61, %v500_v60 }
 0x1d9   :  { %v503_v63 = vpop.f32.mrf.mxu1 }
 0x1da   :  { %v428_v3 = vadd.f32 %v502_v62, %v483_v0 }
 0x1db   :  { %v504_v1 = vpop.f32.mrf.mxu1 }
 0x1dc   :  { %v505_v2 = vadd.f32 %v504_v1, %v503_v63  ;;  %430 = vst [vmem:[#allocation8] sm:$0xff] %v428_v3 }
 0x1de   :  { %v429_v4 = vadd.f32 %v505_v2, %v483_v0 }
 0x1e0   :  { %431 = vst [vmem:[#allocation8 + $0x8] sm:$0xff] %v429_v4 }
 0x1e1   :  { %627 = shalt.err (!%p624_p5)
}
 0x1e2   :  { %443 = dma.vmem_to_hbm [thread:$0]  %s438_s18, 256, %s722_s6, [#allocation4], %s644_s26, %s644_s26, %s645_s27  }
 0x1e3   :  { %640 = dma.done.wait [#allocation4], 256  }
 0x1e4   :  { %641 = vsyncadd [#allocation4], 4294967040 }
 0x1e5   :  { %447 = vsyncpa [#allocation3], 1 }
 0x1e6   :  { %448 = vsyncpa [#allocation6], 1 }
 0x1e7   :  { %449 = vsyncpa [#allocation4], 1 }

</bundles_post_ra>
